<compile_context>
chip_gen: v5e
topology: v5e:2x2
jax: 0.10.0
libtpu: 0.0.40
codegen_flags: <defaults>
</compile_context>

<pallas_src>
import functools

import jax
import jax.numpy as jnp
from jax.experimental import pallas as pl
from jax.experimental.pallas import tpu as pltpu

# Deterministic "parameters" of the module (fixed, requires_grad=False).
GRAY_COEFFS = (65.738 / 256.0, 129.057 / 256.0, 25.064 / 256.0)

_VMEM_FOOTPRINT_BUDGET = 32 * 1024 * 1024   # target total VMEM footprint
_VMEM_LIMIT_BYTES = 48 * 1024 * 1024        # explicit scoped-VMEM limit (all gens)
_N_TEMPS = 8                                # upper bound on tile-sized f32 temps


def _cdiv(a, b):
    return -(-a // b)


def _round_up(x, m):
    return _cdiv(x, m) * m


def _vpu_has_bf16():
    """True on chips with a native bf16 VPU (v6e / v7x); conservative default."""
    try:
        kind = jax.devices()[0].device_kind.lower()
    except Exception:
        return False
    return any(tag in kind for tag in ("v6", "v7", "7x"))


def _gray_rows(ref, rows, dtype):
    """Load `rows` of every channel of a (C, R, Wp) ref and convert to gray.

    Slicing the Ref *before* the load keeps halo reads to one sublane row per
    channel instead of the whole (C, sub, Wp) block.
    """
    if ref.shape[0] == 3:
        r = ref[0, rows, :].astype(dtype)
        g = ref[1, rows, :].astype(dtype)
        b = ref[2, rows, :].astype(dtype)
        return GRAY_COEFFS[0] * r + GRAY_COEFFS[1] * g + GRAY_COEFFS[2] * b
    return ref[0, rows, :].astype(dtype)


def _grad_layer_kernel(x_ref, xu_ref, xd_ref, o_ref, *, H, W, compute_dtype):
    """x_ref: (C, TH, Wp) main tile; xu_ref/xd_ref: (C, sub, Wp) halo blocks just
    above / below the tile; o_ref: (TH, Wp).  H/W are the true image extents;
    the block may overhang the array on the right / bottom edge."""
    TH, Wp = o_ref.shape
    sub = xu_ref.shape[1]
    h = pl.program_id(1)

    gray = _gray_rows(x_ref, slice(None), compute_dtype)          # (TH, Wp)

    col = jax.lax.broadcasted_iota(jnp.int32, (1, Wp), 1)
    row = jax.lax.broadcasted_iota(jnp.int32, (TH, 1), 0)

    if Wp > W:
        # Zero the lane-overhang columns (>= W): removes OOB garbage *and*
        # supplies the conv zero pad on the right edge / wrap source for the
        # left edge (see the horizontal branch below).
        gray = jnp.where(col < W, gray, 0.0)
    if H % TH != 0:
        # Partial last row tile: zero the garbage rows below the image so the
        # bottom edge sees the conv zero pad (their own outputs are discarded).
        gray = jnp.where(row < H - h * TH, gray, 0.0)

    # Halo rows = gray of global rows h*TH - 1 / h*TH + TH, zero at the image
    # top / bottom border.
    up_row = (_gray_rows(xu_ref, slice(sub - 1, sub), compute_dtype)
              * (h > 0).astype(compute_dtype))
    dn_row = (_gray_rows(xd_ref, slice(0, 1), compute_dtype)
              * (h < pl.num_programs(1) - 1).astype(compute_dtype))

    # Vertical gradient first so g_up/g_dn die before g_l/g_r exist (lower
    # peak tile-sized liveness).  Boundary rows are overwritten by the halo
    # splice, so the sublane shifts can stay as jnp.roll.
    g_up = jnp.where(row == 0, up_row, jnp.roll(gray, 1, axis=0))         # gray[i-1, j]
    g_dn = jnp.where(row == TH - 1, dn_row, jnp.roll(gray, -1, axis=0))   # gray[i+1, j]
    x_v = (g_dn - g_up).astype(jnp.float32)

    # Horizontal gradient.
    if Wp > W:
        # Column Wp-1 is zero, so the lane-rotate wrap already implements the
        # conv zero pad on both edges -> no boundary selects needed.
        # pltpu.roll guarantees an XLU lane rotate (XLU is idle here).
        g_l = pltpu.roll(gray, 1, 1)                                      # gray[i, j-1]
        g_r = pltpu.roll(gray, Wp - 1, 1)                                 # gray[i, j+1]
        x_h = (g_r - g_l).astype(jnp.float32)
    else:
        g_l = jnp.where(col >= 1, jnp.roll(gray, 1, axis=1), 0.0)
        g_r = jnp.where(col < W - 1, jnp.roll(gray, -1, axis=1), 0.0)
        x_h = (g_r - g_l).astype(jnp.float32)

    o_ref[...] = jnp.sqrt(x_v * x_v + x_h * x_h + 1e-6).astype(o_ref.dtype)


def _choose_row_tile(N, C, H, Wp, itemsize, sub):
    """Row-tile height: multiple of `sub`, sized so that (2x main block +
    2x output block + ~8 tile-sized f32 temporaries) stays under the footprint
    budget on every TPU generation."""
    per_row = Wp * ((2 * C + 2) * itemsize + _N_TEMPS * 4)
    th = (_VMEM_FOOTPRINT_BUDGET // per_row) // sub * sub
    th = max(sub, min(th, _round_up(H, sub)))
    if N == 1 and H > sub:
        # v7x shards the parallel grid axes over 2 TensorCores: keep at least
        # two row tiles when there is only one sample.
        th = min(th, max(sub, _round_up(_cdiv(H, 2), sub)))
    # Re-balance: same tile count, less waste in the last (partial) tile.
    nt = _cdiv(H, th)
    th = max(sub, _round_up(_cdiv(H, nt), sub))
    return th


def grad_layer(x):
    """x: (N, C, H, W) with C in {1, 3}. Returns (N, 1, H, W) with x.dtype."""
    N, C, H, W = x.shape
    if C not in (1, 3):
        raise ValueError(f"GradLayer expects 1 or 3 input channels, got {C}")

    itemsize = jnp.dtype(x.dtype).itemsize
    sub = 8 * max(1, 4 // max(1, itemsize))   # sublane quantum for this dtype
    # Lane padding lives only in the VMEM block (blocks may overhang the
    # array); the HBM arrays stay unpadded -> no pad/crop passes, no inflated
    # HBM traffic for unaligned W.
    Wp = _round_up(max(W, 1), 128)
    TH = _choose_row_tile(N, C, H, Wp, itemsize, sub)
    NH = _cdiv(H, TH)
    thb = TH // sub                  # tile height in halo-block (sub-row) units
    nhb = _cdiv(H, sub)              # number of halo blocks along H

    # bf16 inputs keep the gray/shift/diff math in bf16 on chips with a bf16
    # VPU (v6e/v7x); squares + sqrt are always f32.
    compute_dtype = (jnp.bfloat16
                     if (x.dtype == jnp.bfloat16 and _vpu_has_bf16())
                     else jnp.float32)

    main_spec = pl.BlockSpec((None, C, TH, Wp), lambda n, h: (n, 0, h, 0))
    up_spec = pl.BlockSpec(
        (None, C, sub, Wp),
        lambda n, h: (n, 0, jnp.maximum(h * thb - 1, 0), 0))
    dn_spec = pl.BlockSpec(
        (None, C, sub, Wp),
        lambda n, h: (n, 0, jnp.minimum((h + 1) * thb, nhb - 1), 0))
    out_spec = pl.BlockSpec((None, None, TH, Wp), lambda n, h: (n, 0, h, 0))

    kernel = functools.partial(_grad_layer_kernel, H=H, W=W,
                               compute_dtype=compute_dtype)

    flops_per_px = (5 if C == 3 else 0) + 8
    cost = pl.CostEstimate(
        flops=N * H * W * flops_per_px,
        transcendentals=N * H * W,
        bytes_accessed=(C + 1) * N * H * W * itemsize)

    return pl.pallas_call(
        kernel,
        out_shape=jax.ShapeDtypeStruct((N, 1, H, W), x.dtype),
        grid=(N, NH),
        in_specs=[main_spec, up_spec, dn_spec],
        out_specs=out_spec,
        compiler_params=pltpu.CompilerParams(
            dimension_semantics=("parallel", "parallel"),
            vmem_limit_bytes=_VMEM_LIMIT_BYTES),
        cost_estimate=cost,
    )(x, x, x)


def _grad_layer_ref(x):
    """Pure-JAX reference mirroring the PyTorch forward."""
    x = x.astype(jnp.float32)
    if x.shape[1] == 3:
        conv = jnp.asarray(GRAY_COEFFS, jnp.float32).reshape(1, 3, 1, 1)
        x = (x * conv).sum(axis=1, keepdims=True)
    p = jnp.pad(x, ((0, 0), (0, 0), (1, 1), (1, 1)))
    x_v = p[:, :, 2:, 1:-1] - p[:, :, :-2, 1:-1]
    x_h = p[:, :, 1:-1, 2:] - p[:, :, 1:-1, :-2]
    return jnp.sqrt(x_v * x_v + x_h * x_h + 1e-6)


if __name__ == "__main__":
    key = jax.random.PRNGKey(0)
    k1, k2, k3 = jax.random.split(key, 3)

    # C=3, small shape: single row tile, lane overhang 16 -> 128 (masked).
    x1 = jax.random.uniform(k1, (2, 3, 16, 16), dtype=jnp.float32)
    o1 = jax.block_until_ready(grad_layer(x1))
    r1 = _grad_layer_ref(x1)
    assert o1.shape == (2, 1, 16, 16), o1.shape
    assert o1.dtype == x1.dtype, o1.dtype
    assert jnp.allclose(o1, r1, atol=1e-5, rtol=1e-5), "mismatch vs reference (C=3)"

    # C=1, multi-tile halo path, partial last row tile, unaligned W
    # (no HBM-side padding: lane overhang lives only in the VMEM block).
    x2 = jax.random.uniform(k2, (1, 1, 60, 136), dtype=jnp.float32)
    o2 = jax.block_until_ready(grad_layer(x2))
    r2 = _grad_layer_ref(x2)
    assert o2.shape == (1, 1, 60, 136), o2.shape
    assert jnp.allclose(o2, r2, atol=1e-5, rtol=1e-5), "mismatch vs reference (tiled, unaligned W)"

    # C=3, W an exact multiple of 128 (lane-dense, wrap-fix column path) plus a
    # partial last row tile with N == 1 (forces >= 2 row tiles).
    x3 = jax.random.uniform(k3, (1, 3, 24, 128), dtype=jnp.float32)
    o3 = jax.block_until_ready(grad_layer(x3))
    r3 = _grad_layer_ref(x3)
    assert o3.shape == (1, 1, 24, 128), o3.shape
    assert jnp.allclose(o3, r3, atol=1e-5, rtol=1e-5), "mismatch vs reference (Wp == W)"

    print("KERNEL_OK")
</pallas_src>

<mosaic_0001>
module attributes {stable_mosaic.version = 11 : i64} {
  func.func @_grad_layer_kernel(%arg0: i32, %arg1: i32, %arg2: memref<1x3x16x128xf32, #tpu.memory_space<vmem>>, %arg3: memref<1x3x8x128xf32, #tpu.memory_space<vmem>>, %arg4: memref<1x3x8x128xf32, #tpu.memory_space<vmem>>, %arg5: memref<1x1x16x128xf32, #tpu.memory_space<vmem>>) attributes {dimension_semantics = [#tpu.dimension_semantics<parallel>, #tpu.dimension_semantics<parallel>], iteration_bounds = array<i64: 2, 1>, scalar_prefetch = 0 : i64, scratch_operands = 0 : i64, tpu.core_type = #tpu.core_type<tc>, window_params = [{transform_indices = @transform_0, window_bounds = array<i64: 1, 3, 16, 128>}, {transform_indices = @transform_1, window_bounds = array<i64: 1, 3, 8, 128>}, {transform_indices = @transform_2, window_bounds = array<i64: 1, 3, 8, 128>}, {transform_indices = @transform_3, window_bounds = array<i64: 1, 1, 16, 128>}]} {
    %c0 = arith.constant 0 : index
    %c0_0 = arith.constant 0 : index
    %c0_1 = arith.constant 0 : index
    %c0_2 = arith.constant 0 : index
    %0 = vector.load %arg2[%c0, %c0_0, %c0_1, %c0_2] : memref<1x3x16x128xf32, #tpu.memory_space<vmem>>, vector<1x1x16x128xf32>
    %1 = vector.shape_cast %0 : vector<1x1x16x128xf32> to vector<16x128xf32>
    %c0_3 = arith.constant 0 : index
    %c1 = arith.constant 1 : index
    %c0_4 = arith.constant 0 : index
    %c0_5 = arith.constant 0 : index
    %2 = vector.load %arg2[%c0_3, %c1, %c0_4, %c0_5] : memref<1x3x16x128xf32, #tpu.memory_space<vmem>>, vector<1x1x16x128xf32>
    %3 = vector.shape_cast %2 : vector<1x1x16x128xf32> to vector<16x128xf32>
    %c0_6 = arith.constant 0 : index
    %c2 = arith.constant 2 : index
    %c0_7 = arith.constant 0 : index
    %c0_8 = arith.constant 0 : index
    %4 = vector.load %arg2[%c0_6, %c2, %c0_7, %c0_8] : memref<1x3x16x128xf32, #tpu.memory_space<vmem>>, vector<1x1x16x128xf32>
    %5 = vector.shape_cast %4 : vector<1x1x16x128xf32> to vector<16x128xf32>
    %cst = arith.constant 0.256789058 : f32
    %6 = vector.broadcast %cst : f32 to vector<16x128xf32>
    %7 = arith.mulf %6, %1 : vector<16x128xf32>
    %cst_9 = arith.constant 0.504128933 : f32
    %8 = vector.broadcast %cst_9 : f32 to vector<16x128xf32>
    %9 = arith.mulf %8, %3 : vector<16x128xf32>
    %10 = arith.addf %7, %9 : vector<16x128xf32>
    %cst_10 = arith.constant 0.0979062467 : f32
    %11 = vector.broadcast %cst_10 : f32 to vector<16x128xf32>
    %12 = arith.mulf %11, %5 : vector<16x128xf32>
    %13 = arith.addf %10, %12 : vector<16x128xf32>
    %14 = tpu.iota {dimensions = array<i32: 1>} : vector<1x128xi32>
    %15 = tpu.iota {dimensions = array<i32: 0>} : vector<16x1xi32>
    %c16_i32 = arith.constant 16 : i32
    %16 = vector.broadcast %c16_i32 : i32 to vector<1x128xi32>
    %17 = arith.cmpi slt, %14, %16 : vector<1x128xi32>
    %cst_11 = arith.constant 0.000000e+00 : f32
    %18 = vector.shape_cast %17 : vector<1x128xi1> to vector<1x128xi1>
    %19 = vector.broadcast %18 : vector<1x128xi1> to vector<16x128xi1>
    %20 = vector.broadcast %cst_11 : f32 to vector<16x128xf32>
    %21 = arith.select %19, %13, %20 : vector<16x128xi1>, vector<16x128xf32>
    %c0_12 = arith.constant 0 : index
    %c0_13 = arith.constant 0 : index
    %c7 = arith.constant 7 : index
    %c0_14 = arith.constant 0 : index
    %22 = vector.load %arg3[%c0_12, %c0_13, %c7, %c0_14] : memref<1x3x8x128xf32, #tpu.memory_space<vmem>>, vector<1x1x1x128xf32>
    %23 = vector.shape_cast %22 : vector<1x1x1x128xf32> to vector<1x128xf32>
    %c0_15 = arith.constant 0 : index
    %c1_16 = arith.constant 1 : index
    %c7_17 = arith.constant 7 : index
    %c0_18 = arith.constant 0 : index
    %24 = vector.load %arg3[%c0_15, %c1_16, %c7_17, %c0_18] : memref<1x3x8x128xf32, #tpu.memory_space<vmem>>, vector<1x1x1x128xf32>
    %25 = vector.shape_cast %24 : vector<1x1x1x128xf32> to vector<1x128xf32>
    %c0_19 = arith.constant 0 : index
    %c2_20 = arith.constant 2 : index
    %c7_21 = arith.constant 7 : index
    %c0_22 = arith.constant 0 : index
    %26 = vector.load %arg3[%c0_19, %c2_20, %c7_21, %c0_22] : memref<1x3x8x128xf32, #tpu.memory_space<vmem>>, vector<1x1x1x128xf32>
    %27 = vector.shape_cast %26 : vector<1x1x1x128xf32> to vector<1x128xf32>
    %cst_23 = arith.constant 0.256789058 : f32
    %28 = vector.broadcast %cst_23 : f32 to vector<1x128xf32>
    %29 = arith.mulf %28, %23 : vector<1x128xf32>
    %cst_24 = arith.constant 0.504128933 : f32
    %30 = vector.broadcast %cst_24 : f32 to vector<1x128xf32>
    %31 = arith.mulf %30, %25 : vector<1x128xf32>
    %32 = arith.addf %29, %31 : vector<1x128xf32>
    %cst_25 = arith.constant 0.0979062467 : f32
    %33 = vector.broadcast %cst_25 : f32 to vector<1x128xf32>
    %34 = arith.mulf %33, %27 : vector<1x128xf32>
    %35 = arith.addf %32, %34 : vector<1x128xf32>
    %c0_i32 = arith.constant 0 : i32
    %36 = arith.cmpi sgt, %arg1, %c0_i32 : i32
    %37 = arith.extui %36 : i1 to i32
    %38 = arith.sitofp %37 : i32 to f32
    %39 = vector.broadcast %38 : f32 to vector<1x128xf32>
    %40 = arith.mulf %35, %39 : vector<1x128xf32>
    %c0_26 = arith.constant 0 : index
    %c0_27 = arith.constant 0 : index
    %c0_28 = arith.constant 0 : index
    %c0_29 = arith.constant 0 : index
    %41 = vector.load %arg4[%c0_26, %c0_27, %c0_28, %c0_29] : memref<1x3x8x128xf32, #tpu.memory_space<vmem>>, vector<1x1x1x128xf32>
    %42 = vector.shape_cast %41 : vector<1x1x1x128xf32> to vector<1x128xf32>
    %c0_30 = arith.constant 0 : index
    %c1_31 = arith.constant 1 : index
    %c0_32 = arith.constant 0 : index
    %c0_33 = arith.constant 0 : index
    %43 = vector.load %arg4[%c0_30, %c1_31, %c0_32, %c0_33] : memref<1x3x8x128xf32, #tpu.memory_space<vmem>>, vector<1x1x1x128xf32>
    %44 = vector.shape_cast %43 : vector<1x1x1x128xf32> to vector<1x128xf32>
    %c0_34 = arith.constant 0 : index
    %c2_35 = arith.constant 2 : index
    %c0_36 = arith.constant 0 : index
    %c0_37 = arith.constant 0 : index
    %45 = vector.load %arg4[%c0_34, %c2_35, %c0_36, %c0_37] : memref<1x3x8x128xf32, #tpu.memory_space<vmem>>, vector<1x1x1x128xf32>
    %46 = vector.shape_cast %45 : vector<1x1x1x128xf32> to vector<1x128xf32>
    %cst_38 = arith.constant 0.256789058 : f32
    %47 = vector.broadcast %cst_38 : f32 to vector<1x128xf32>
    %48 = arith.mulf %47, %42 : vector<1x128xf32>
    %cst_39 = arith.constant 0.504128933 : f32
    %49 = vector.broadcast %cst_39 : f32 to vector<1x128xf32>
    %50 = arith.mulf %49, %44 : vector<1x128xf32>
    %51 = arith.addf %48, %50 : vector<1x128xf32>
    %cst_40 = arith.constant 0.0979062467 : f32
    %52 = vector.broadcast %cst_40 : f32 to vector<1x128xf32>
    %53 = arith.mulf %52, %46 : vector<1x128xf32>
    %54 = arith.addf %51, %53 : vector<1x128xf32>
    %c0_i32_41 = arith.constant 0 : i32
    %55 = arith.cmpi slt, %arg1, %c0_i32_41 : i32
    %56 = arith.extui %55 : i1 to i32
    %57 = arith.sitofp %56 : i32 to f32
    %58 = vector.broadcast %57 : f32 to vector<1x128xf32>
    %59 = arith.mulf %54, %58 : vector<1x128xf32>
    %c0_i32_42 = arith.constant 0 : i32
    %60 = vector.broadcast %c0_i32_42 : i32 to vector<16x1xi32>
    %61 = arith.cmpi eq, %15, %60 : vector<16x1xi32>
    %62 = vector.extract_strided_slice %21 {offsets = [15, 0], sizes = [1, 128], strides = [1, 1]} : vector<16x128xf32> to vector<1x128xf32>
    %63 = vector.extract_strided_slice %21 {offsets = [0, 0], sizes = [15, 128], strides = [1, 1]} : vector<16x128xf32> to vector<15x128xf32>
    %64 = tpu.concatenate %62, %63 in 0 : vector<1x128xf32>, vector<15x128xf32> -> vector<16x128xf32>
    %65 = vector.shape_cast %61 : vector<16x1xi1> to vector<16x1xi1>
    %66 = vector.broadcast %65 : vector<16x1xi1> to vector<16x128xi1>
    %67 = vector.shape_cast %40 : vector<1x128xf32> to vector<1x128xf32>
    %68 = vector.broadcast %67 : vector<1x128xf32> to vector<16x128xf32>
    %69 = arith.select %66, %68, %64 : vector<16x128xi1>, vector<16x128xf32>
    %c15_i32 = arith.constant 15 : i32
    %70 = vector.broadcast %c15_i32 : i32 to vector<16x1xi32>
    %71 = arith.cmpi eq, %15, %70 : vector<16x1xi32>
    %72 = vector.extract_strided_slice %21 {offsets = [1, 0], sizes = [15, 128], strides = [1, 1]} : vector<16x128xf32> to vector<15x128xf32>
    %73 = vector.extract_strided_slice %21 {offsets = [0, 0], sizes = [1, 128], strides = [1, 1]} : vector<16x128xf32> to vector<1x128xf32>
    %74 = tpu.concatenate %72, %73 in 0 : vector<15x128xf32>, vector<1x128xf32> -> vector<16x128xf32>
    %75 = vector.shape_cast %71 : vector<16x1xi1> to vector<16x1xi1>
    %76 = vector.broadcast %75 : vector<16x1xi1> to vector<16x128xi1>
    %77 = vector.shape_cast %59 : vector<1x128xf32> to vector<1x128xf32>
    %78 = vector.broadcast %77 : vector<1x128xf32> to vector<16x128xf32>
    %79 = arith.select %76, %78, %74 : vector<16x128xi1>, vector<16x128xf32>
    %80 = arith.subf %79, %69 : vector<16x128xf32>
    %c1_i32 = arith.constant 1 : i32
    %81 = tpu.dynamic_rotate %21 by %c1_i32 dim 1 : vector<16x128xf32>, i32 -> vector<16x128xf32>
    %c127_i32 = arith.constant 127 : i32
    %82 = tpu.dynamic_rotate %21 by %c127_i32 dim 1 : vector<16x128xf32>, i32 -> vector<16x128xf32>
    %83 = arith.subf %82, %81 : vector<16x128xf32>
    %84 = arith.mulf %80, %80 : vector<16x128xf32>
    %85 = arith.mulf %83, %83 : vector<16x128xf32>
    %86 = arith.addf %84, %85 : vector<16x128xf32>
    %cst_43 = arith.constant 9.99999997E-7 : f32
    %87 = vector.broadcast %cst_43 : f32 to vector<16x128xf32>
    %88 = arith.addf %86, %87 : vector<16x128xf32>
    %89 = math.sqrt %88 : vector<16x128xf32>
    %c0_44 = arith.constant 0 : index
    %c0_45 = arith.constant 0 : index
    %c0_46 = arith.constant 0 : index
    %c0_47 = arith.constant 0 : index
    %90 = vector.load %arg5[%c0_44, %c0_45, %c0_46, %c0_47] : memref<1x1x16x128xf32, #tpu.memory_space<vmem>>, vector<1x1x16x128xf32>
    %91 = vector.shape_cast %90 : vector<1x1x16x128xf32> to vector<16x128xf32>
    %92 = vector.shape_cast %89 : vector<16x128xf32> to vector<1x1x16x128xf32>
    tpu.vector_store %arg5[%c0_44, %c0_45, %c0_46, %c0_47], %92 {strides = array<i32>} : memref<1x1x16x128xf32, #tpu.memory_space<vmem>>, vector<1x1x16x128xf32>,
    return
  }
  func.func @transform_0(%arg0: i32, %arg1: i32) -> (i32, i32, i32, i32) {
    %c0_i32 = arith.constant 0 : i32
    %c0_i32_0 = arith.constant 0 : i32
    %c0_i32_1 = arith.constant 0 : i32
    return %arg0, %c0_i32, %arg1, %c0_i32_0 : i32, i32, i32, i32
  }
  func.func @transform_1(%arg0: i32, %arg1: i32) -> (i32, i32, i32, i32) {
    %c2_i32 = arith.constant 2 : i32
    %0 = arith.muli %arg1, %c2_i32 : i32
    %c1_i32 = arith.constant 1 : i32
    %1 = arith.subi %0, %c1_i32 : i32
    %c0_i32 = arith.constant 0 : i32
    %2 = arith.maxsi %1, %c0_i32 : i32
    %c0_i32_0 = arith.constant 0 : i32
    %c0_i32_1 = arith.constant 0 : i32
    %c0_i32_2 = arith.constant 0 : i32
    return %arg0, %c0_i32_0, %2, %c0_i32_1 : i32, i32, i32, i32
  }
  func.func @transform_2(%arg0: i32, %arg1: i32) -> (i32, i32, i32, i32) {
    %c1_i32 = arith.constant 1 : i32
    %0 = arith.addi %arg1, %c1_i32 : i32
    %c2_i32 = arith.constant 2 : i32
    %1 = arith.muli %0, %c2_i32 : i32
    %c1_i32_0 = arith.constant 1 : i32
    %2 = arith.minsi %1, %c1_i32_0 : i32
    %c0_i32 = arith.constant 0 : i32
    %c0_i32_1 = arith.constant 0 : i32
    %c0_i32_2 = arith.constant 0 : i32
    return %arg0, %c0_i32, %2, %c0_i32_1 : i32, i32, i32, i32
  }
  func.func @transform_3(%arg0: i32, %arg1: i32) -> (i32, i32, i32, i32) {
    %c0_i32 = arith.constant 0 : i32
    %c0_i32_0 = arith.constant 0 : i32
    %c0_i32_1 = arith.constant 0 : i32
    return %arg0, %c0_i32, %arg1, %c0_i32_0 : i32, i32, i32, i32
  }
}

</mosaic_0001>

<bundles_post_ra>
// kernel: tpu_custom_call.1
= control target key start
LH: loop header
LB: loop body
LE: loop exit
PB: predicated region body
PF: predicated region fallthrough
CT: control target
= control target key end

     0   :  { %s1118_s0 = inlined_call_operand.hbm [shape: f32[2,3,16,16], index: 0, kind: input, shape index: {}]   ;;  %s1119_s1 = inlined_call_operand.hbm [shape: f32[2,3,16,16], index: 1, kind: input, shape index: {}]   ;;  %s1120_s2 = inlined_call_operand.hbm [shape: f32[2,3,16,16], index: 2, kind: input, shape index: {}]   ;;  %s1121_s3 = inlined_call_operand.hbm [shape: f32[2,1,16,16], index: 3, kind: output, shape index: {}]  }
   0x1   :  { %1132 = sst [smem:[#allocation20_spill]] %s1119_s1 }
   0x2   :  { %8 = vsyncpa [#allocation3], 0 }
   0x3   :  { %10 = vsyncpa [#allocation3 + $0x1], 0 }
   0x4   :  { %11 = vsyncpa [#allocation6], 0 }
   0x5   :  { %13 = vsyncpa [#allocation6 + $0x1], 0 }
   0x6   :  { %14 = vsyncpa [#allocation4], 0 }
   0x7   :  { %16 = vsyncpa [#allocation4 + $0x1], 0  ;;  %s944_s12 = smov 0   ;;  %s946_s13 = smov 0  }
   0x8   :  { %s948_s14 = smov 0   ;;  %s950_s15 = smov 0  }
   0x9   :  { %s952_s16 = smov 0   ;;  %s954_s17 = smov 0  }
   0xa LB: > { %1133 = sst [smem:[#allocation12_spill]] %s895_s12  ;;  %s975_s18 = sadd.s32 4294967295, %s915_s17   ;;  %s915_s17 = sphi %s954_s17, %s22_s17   ;;  %s911_s16 = sphi %s952_s16, %s1156_s16   ;;  %s907_s15 = sphi %s950_s15, %s1155_s15   ;;  %s903_s14 = sphi %s948_s14, %s1154_s14   ;;  %s899_s13 = sphi %s946_s13, %s1158_s13   ;;  %s895_s12 = sphi %s944_s12, %s1157_s12  }
   0xb   : > { %1134 = sst [smem:[#allocation13_spill]] %s903_s14  ;;  %s623_s19 = sadd.s32 4294967294, %s915_s17  }
   0xc   : > { %1135 = sst [smem:[#allocation14_spill]] %s911_s16  ;;  %s34_s20 = sadd.s32 1, %s911_s16 }
   0xd   : > { %1136 = sst [smem:[#allocation15_spill]] %s915_s17  ;;  %s43_s21 = sadd.s32 1, %s903_s14 }
   0xe   : > { %p36_p0 = scmp.ge.s32.totalorder %s34_s20, 2  ;;  %p50_p1 = scmp.ne.s32.totalorder %s903_s14, %s899_s13 }
   0xf   : > { %p51_p2 = scmp.eq.s32.totalorder %s915_s17, 0  ;;  %p56_p3 = scmp.ne.s32.totalorder %s899_s13, %s895_s12 }
  0x10   : > { %s1160_s20 = smov (%p36_p0, %s34_s20), 0  ;;  %p57_p5 = scmp.eq.s32.totalorder %s975_s18, 0 }
  0x11   : > { %1137 = sst [smem:[#allocation16_spill]] %s1160_s20  ;;  %p987_p4 = por %p51_p2, %p50_p1 }
  0x12   : > { %s38_s23 = ssub.s32 %s911_s16, %s1160_s20  ;;  %p154_p6 = scmp.eq.s32.totalorder %s975_s18, 1 }
  0x13   : > { %p41_p7 = scmp.eq.s32.totalorder %s38_s23, 0  ;;  %p995_p8 = por %p57_p5, %p56_p3 }
  0x14   : > { %p999_p9 = por %p154_p6, %p50_p1  ;;  %p160_p10 = scmp.eq.s32.totalorder %s623_s19, 1 }
  0x15   : > { %s1004_s26 = scalar_select %p41_p7, %s903_s14, %s43_s21  }
  0x16   : > { %s1140_s25 = scalar_select %p999_p9, 1, 0 }
  0x17   : > { %1142 = sst [smem:[#allocation18_spill]] %s1004_s26  ;;  %p1006_p11 = por %p160_p10, %p56_p3 }
  0x18   : > { %1141 = sst [smem:[#allocation17_spill]] %s1140_s25  ;;  %p625_p12 = scmp.ge.s32.totalorder %s915_s17, 2 }
  0x19   : > { %s1143_s27 = scalar_select %p1006_p11, 1, 0 }
  0x1a   : > { %p677_p13 = scmp.lt.s32.totalorder %s915_s17, 2  ;;  %s1013_s28 = sand.u32 1, %s903_s14  }
  0x1b   : > { %1144 = sst [smem:[#allocation19_spill]] %s1143_s27  ;;  %s648_s29 = smul.u32 48, %s911_s16 }
  0x1c   : > { %p1018_p0 = pnand %p677_p13, %p987_p4  ;;  %s204_s4 = sand.u32 1, %s915_s17  }
  0x1d   : > { %s1122_s5 = smul.u32 24, %s1013_s28  ;;  %s1146_s1 = sld [smem:[#allocation20_spill]] }
  0x1e   : > { %s205_s19 = scalar_lea.sflag [#allocation6], %s204_s4  ;;  %s917_s21 = smov 256  }
  0x1f   : > { %s208_s10 = scalar_lea.vmem [#allocation5], %s1122_s5  ;;  %s918_s22 = smov 128  }
  0x20   : > { %s221_s11 = sshll.u32 %s208_s10, 4  ;;  %s919_s23 = smov 8   ;;  %s222_s11 = int_to_ptr.vmem [resolvable:$true] %s221_s11 }
  0x21   : > { %p629_p1 = scmp.ge.s32.totalorder %s915_s17, 1  ;;  %p256_p2 = scmp.lt.s32.totalorder %s915_s17, 3 }
  0x22   : > { %s647_s7 = smul.u32 48, %s1013_s28  ;;  %s191_s4 = scalar_lea.hbm %s1118_s0, %s648_s29 }
  0x23   : > { %s218_s8 = scalar_lea.hbm %s1146_s1, %s648_s29  ;;  %p1033_p3 = pnand %p629_p1, %p256_p2 }
  0x24   : > { %s219_s9 = sshll.u32 %s218_s8, 4  ;;  %s192_s5 = sshll.u32 %s191_s4, 4  ;;  %s220_s9 = int_to_ptr.hbm [resolvable:$true] %s219_s9  ;;  %s193_s5 = int_to_ptr.hbm [resolvable:$true] %s192_s5 }
  0x25   : > { %669 = dma.hbm_to_vmem [thread:$0]  (!%p1018_p0), %s220_s9, 384, %s222_s11, %s205_s19, %s917_s21, %s918_s22, %s919_s23  }
  0x26   : > { %s184_s1 = scalar_lea.vmem [#allocation2], %s647_s7  ;;  %s645_s16 = sadd.s32 8, %s648_s29 }
  0x27   : > { %s194_s20 = sshll.u32 %s184_s1, 4  ;;  %s245_s26 = scalar_lea.hbm %s1120_s2, %s645_s16  ;;  %s195_s20 = int_to_ptr.vmem [resolvable:$true] %s194_s20 }
  0x28   : > { %s181_s14 = scalar_lea.sflag [#allocation3], %s1013_s28  ;;  %s246_s17 = sshll.u32 %s245_s26, 4  ;;  %s247_s17 = int_to_ptr.hbm [resolvable:$true] %s246_s17 }
  0x29   : > { %666 = dma.hbm_to_vmem [thread:$0]  (!%p1018_p0), %s193_s5, 768, %s195_s20, %s181_s14, %s918_s22, %s918_s22, %s919_s23  }
  0x2a   : > { %s1148_s27 = smul.u32 24, %s1013_s28  ;;  %s1054_s1 = sand.u32 (!%p1033_p3), 1, %s899_s13  }
  0x2b   : > { %260 = sbr.rel (%p1033_p3) target bundleno = 217 (0xd9), region = 32  ;;  %s263_s29 = scalar_lea.sflag (!%p1033_p3), [#allocation3], %s1054_s1 }
  0x2c   : > { %s235_s12 = scalar_lea.vmem [#allocation7], %s1148_s27  ;;  %s653_s16 = smul.u32 (!%p1033_p3), 48, %s1054_s1 }
  0x2d   : > { %s248_s25 = sshll.u32 %s235_s12, 4  ;;  %s249_s25 = int_to_ptr.vmem [resolvable:$true] %s248_s25 }
  0x2e   : > { %672 = dma.hbm_to_vmem [thread:$0]  (!%p1018_p0), %s247_s17, 384, %s249_s25, %s205_s19, %s917_s21, %s918_s22, %s919_s23  }
  0x2f   : > { %s266_s14 = scalar_lea.vmem (!%p1033_p3), [#allocation2], %s653_s16 }
  0x30   : > { %882 = dma.done.wait (%p995_p8), %s263_s29, 768  }
  0x31   : > { %884 = vsyncadd (%p995_p8), %s263_s29, 4294966528  ;;  %s272_s12 = sand.u32 1, %s975_s18   ;;  %s654_s17 = smul.u32 24, %s1054_s1 }
  0x32   : > { %s273_s20 = scalar_lea.sflag [#allocation6], %s272_s12 }
  0x33   : > { %s1066_s25 = scalar_lea.vmem [#allocation5], %s654_s17 }
  0x34   : > { %886 = dma.done.wait (%p995_p8), %s273_s20, 768  }
  0x35   : > { %888 = vsyncadd (%p995_p8), %s273_s20, 4294966528  ;;  %v348_v0 = vlaneseq  ;;  %v330_v1 = vld [vmem:[%s266_s14] sm:$0xff]  ;;  %v631_v2 = vld [vmem:[%s266_s14 + $0x10] sm:$0xff]  ;;  %s920_s18 = smov 127   ;;  %s921_s24 = smov 1   ;;  %vm394_vm1 = vcmask 1040384  }
  0x36   : > { %v633_v3 = vld [vmem:[%s266_s14 + $0x20] sm:$0xff]  ;;  %v338_v5 = vmul.f32 0.25678906, %v330_v1  ;;  %v340_v6 = vmul.f32 0.50412893, %v631_v2  ;;  %v331_v8 = vld [vmem:[%s266_s14 + $0x8] sm:$0xff] }
  0x37   : > { %v349_v4 = vand.u32 127, %v348_v0  ;;  %v344_v7 = vmul.f32 0.09790625, %v633_v3  ;;  %v632_v9 = vld [vmem:[%s266_s14 + $0x18] sm:$0xff]  ;;  %v634_v10 = vld [vmem:[%s266_s14 + $0x28] sm:$0xff]  ;;  %v351_v28 = vshrl.u32 %v348_v0, 7 }
  0x38   : > { %v342_v11 = vadd.f32 %v340_v6, %v338_v5  ;;  %v339_v12 = vmul.f32 0.25678906, %v331_v8  ;;  %v341_v13 = vmul.f32 0.50412893, %v632_v9  ;;  %v345_v16 = vmul.f32 0.09790625, %v634_v10 }
  0x39   : > { %vm353_vm0 = vcmp.lt.s32.totalorder %v349_v4, 16  ;;  %v358_v20 = vld [vmem:[%s1066_s25 + $0x7] sm:$0x1]  ;;  %v635_v21 = vld [vmem:[%s1066_s25 + $0xf] sm:$0x1]  ;;  %s286_s26 = scalar_lea.vmem [#allocation7], %s654_s17 }
  0x3a   : > { %v346_v14 = vadd.f32 %v344_v7, %v342_v11  ;;  %v343_v15 = vadd.f32 %v341_v13, %v339_v12  ;;  %v363_v22 = vmul.f32 0.25678906, %v358_v20  ;;  %v364_v23 = vmul.f32 0.50412893, %v635_v21  ;;  %v636_v24 = vld [vmem:[%s1066_s25 + $0x17] sm:$0x1] }
  0x3b   : > { %v366_v26 = vmul.f32 0.09790625, %v636_v24  ;;  %v373_v34 = vld [vmem:[%s286_s26] sm:$0x1]  ;;  %v637_v35 = vld [vmem:[%s286_s26 + $0x8] sm:$0x1] }
  0x3c   : > { %v356_v17 = vsel %vm353_vm0, %v346_v14, 0.0  ;;  %v347_v18 = vadd.f32 %v345_v16, %v343_v15  ;;  %v365_v25 = vadd.f32 %v364_v23, %v363_v22  ;;  %v378_v37 = vmul.f32 0.25678906, %v373_v34  ;;  %v638_v40 = vld [vmem:[%s286_s26 + $0x10] sm:$0x1]  ;;  %s630_s27 = sshll.u32 %s1054_s1, 4 }
  0x3d   : > { %430 = vrot.lane.b32.xlu1 %v356_v17, %s920_s18  ;;  %426 = vrot.lane.b32.xlu0 %v356_v17, %s921_s24  ;;  %v395_v29 = vrot.slane %v356_v17, 7  ;;  %v410_v31 = vrot.slane %v356_v17, 1  ;;  %v379_v38 = vmul.f32 0.50412893, %v637_v35  ;;  %vm388_vm2 = vcmp.eq.s32.totalorder %v351_v28, 0  ;;  %s646_s28 = sshll.u32 %s907_s15, 4 }
  0x3e   : > { %v357_v19 = vsel %vm353_vm0, %v347_v18, 0.0  ;;  %v367_v27 = vadd.f32 %v366_v26, %v365_v25  ;;  %vm409_vm3 = vcmask 1046528   ;;  %v381_v44 = vmul.f32 0.09790625, %v638_v40  ;;  %s484_s19 = scalar_lea.hbm %s1121_s3, %s646_s28  ;;  %s319_s21 = scalar_lea.vmem [#allocation8], %s630_s27 }
  0x3f   : > { %v391_v30 = vrot.slane %v357_v19, 7  ;;  %v411_v32 = vrot.slane %v357_v19, 1  ;;  %v380_v43 = vadd.f32 %v379_v38, %v378_v37  ;;  %v352_v48 = vadd.s32 8, %v351_v28  ;;  %s485_s22 = sshll.u32 %s319_s21, 4  ;;  %s487_s6 = sshll.u32 %s484_s19, 4  ;;  %s486_s22 = int_to_ptr.vmem [resolvable:$true] %s485_s22  ;;  %s488_s6 = int_to_ptr.hbm [resolvable:$true] %s487_s6 }
  0x40   : > { %v372_v33 = vmul.f32 0.0, %v367_v27  ;;  %s471_s15 = scalar_lea.sflag [#allocation4], %s1054_s1  ;;  %s843_s7 = sshra.s32 %s488_s6, 4  ;;  %s844_s7 = int_to_ptr.hbm [resolvable:$true] %s843_s7 }
  0x41   : > { %v399_v39 = vsel %vm394_vm1, %v391_v30, %v395_v29  ;;  %v412_v42 = vsel %vm409_vm3, %v410_v31, %v411_v32  ;;  %v382_v46 = vadd.f32 %v381_v44, %v380_v43  ;;  %vm408_vm4 = vcmp.eq.s32.totalorder %v352_v48, 15  ;;  %s845_s8 = scalar_lea.hbm %s844_s7, 16  ;;  %s849_s9 = scalar_lea.hbm %s1121_s3, 32 }
  0x42   : > { %v404_v36 = vperm.slane %v372_v33, 0  ;;  %v416_v50 = vsel %vm409_vm3, %v411_v32, %v410_v31  ;;  %v396_v51 = vsel %vm394_vm1, %v395_v29, %v391_v30  ;;  %p846_p4 = scmp.ne.s32.totalorder %s844_s7, %s845_s8  ;;  %p850_p7 = scmp.lt.s32.totalorder %s844_s7, %s1121_s3 }
  0x43   : > { %v387_v47 = vmul.f32 0.0, %v382_v46  ;;  %p851_p8 = scmp.lt.s32.totalorder %s849_s9, %s845_s8 }
  0x44   : > { %v405_v41 = vsel %vm388_vm2, %v404_v36, %v399_v39  ;;  %p847_p5 = pnand %p846_p4, %p999_p9 }
  0x45   : > { %432 = vrot.lane.b32.xlu1 %v357_v19, %s920_s18  ;;  %428 = vrot.lane.b32.xlu0 %v357_v19, %s921_s24  ;;  %v424_v45 = vsub.f32 %v412_v42, %v405_v41  ;;  %v421_v49 = vperm.slane %v387_v47, 0  ;;  %p852_p10 = por %p851_p8, %p850_p7 }
  0x46   : > { %p848_p6 = pneg %p847_p5 }
  0x47   : > { %v423_v52 = vsel %vm408_vm4, %v421_v49, %v416_v50  ;;  %v436_v57 = vmul.f32 %v424_v45, %v424_v45 }
  0x48   : > { %v425_v53 = vsub.f32 %v423_v52, %v396_v51  ;;  %p853_p13 = pnand %p852_p10, %p848_p6 }
  0x4a   : > { %v437_v0 = vmul.f32 %v425_v53, %v425_v53 }
  0xaf   : > { %v431_v54 = vpop.permute.xlu1 %430  ;;  %v427_v55 = vpop.permute.xlu0 %426 }
  0xb0   : > { %v434_v56 = vsub.f32 %v431_v54, %v427_v55 }
  0xb2   : > { %v438_v58 = vmul.f32 %v434_v56, %v434_v56 }
  0xb4   : > { %v440_v59 = vadd.f32 %v438_v58, %v436_v57 }
  0xb6   : > { %v442_v60 = vadd.f32 1e-06, %v440_v59 }
  0xb7   : > { %v433_v61 = vpop.permute.xlu1 %432  ;;  %v429_v62 = vpop.permute.xlu0 %428 }
  0xb8   : > { %735 = vrsqrt.f32 %v442_v60  ;;  %v435_v63 = vsub.f32 %v433_v61, %v429_v62  ;;  %vm451_vm5 = vcmp.eq.f32.partialorder %v442_v60, inf  ;;  %v454_v14 = vand.u32 2147483648, %v442_v60 }
  0xb9   : > { %vm453_vm6 = vcmp.eq.f32.partialorder %v442_v60, 0.0 }
  0xba   : > { %v439_v1 = vmul.f32 %v435_v63, %v435_v63 }
  0xbc   : > { %v441_v2 = vadd.f32 %v439_v1, %v437_v0 }
  0xbe   : > { %v736_v3 = vpop.eup %735  ;;  %v443_v4 = vadd.f32 1e-06, %v441_v2 }
  0xbf   : > { %v445_v5 = vmul.f32 %v736_v3, %v442_v60 }
  0xc0   : > { %737 = vrsqrt.f32 %v443_v4  ;;  %vm463_vm7 = vcmp.eq.f32.partialorder %v443_v4, inf  ;;  %v466_v21 = vand.u32 2147483648, %v443_v4  ;;  %vm465_vm8 = vcmp.eq.f32.partialorder %v443_v4, 0.0 }
  0xc1   : > { %v446_v6 = vmul.f32 %v736_v3, %v445_v5 }
  0xc3   : > { %v447_v7 = vmul.f32 0.5, %v446_v6 }
  0xc5   : > { %v448_v8 = vsub.f32 1.5, %v447_v7 }
  0xc6   : > { %v738_v9 = vpop.eup %737 }
  0xc7   : > { %v457_v10 = vmul.f32 %v738_v9, %v443_v4  ;;  %v449_v11 = vmul.f32 %v736_v3, %v448_v8 }
  0xc9   : > { %v450_v12 = vmul.f32 %v449_v11, %v442_v60  ;;  %v458_v13 = vmul.f32 %v738_v9, %v457_v10 }
  0xcb   : > { %v452_v15 = vsel %vm451_vm5, %v442_v60, %v450_v12  ;;  %v459_v16 = vmul.f32 0.5, %v458_v13 }
  0xcc   : > { %v455_v17 = vsel %vm453_vm6, %v454_v14, %v452_v15 }
  0xcd   : > { %v460_v18 = vsub.f32 1.5, %v459_v16  ;;  %468 = vst [vmem:[%s319_s21] sm:$0xff] %v455_v17 }
  0xcf   : > { %v461_v19 = vmul.f32 %v738_v9, %v460_v18 }
  0xd1   : > { %v462_v20 = vmul.f32 %v461_v19, %v443_v4 }
  0xd3   : > { %v464_v22 = vsel %vm463_vm7, %v443_v4, %v462_v20 }
  0xd4   : > { %v467_v23 = vsel %vm465_vm8, %v466_v21, %v464_v22 }
  0xd5   : > { %469 = vst [vmem:[%s319_s21 + $0x8] sm:$0xff] %v467_v23 }
  0xd6   : > { %856 = shalt.err (!%p853_p13)
}
  0xd7   : > { %s922_s1 = smov 128   ;;  %s923_s29 = smov 8  }
  0xd8   : > { %661 = dma.vmem_to_hbm [thread:$0]  (%p999_p9), %s486_s22, 256, %s488_s6, %s471_s15, %s922_s1, %s922_s1, %s923_s29  }
  0xd9 PF: > { %s1150_s14 = sld [smem:[#allocation12_spill]]  ;;  %p674_p0 = pnand %p625_p12, %p1006_p11 }
  0xda   : > { %s1152_s17 = sld [smem:[#allocation15_spill]] }
  0xdb   : > { %p675_p1 = pneg %p674_p0 }
  0xdf   : > { %s502_s20 = sand.u32 1, %s1150_s14  }
  0xe0   : > { %s503_s25 = scalar_lea.sflag [#allocation4], %s502_s20 }
  0xe1   : > { %890 = dma.done.wait (%p675_p1), %s503_s25, 256  }
  0xe2   : > { %892 = vsyncadd (%p675_p1), %s503_s25, 4294967040  ;;  %s22_s17 = sadd.s32 1, %s1152_s17   ;;  %s1153_s18 = sld [smem:[#allocation13_spill]] }
  0xe3   : > { %p19_p2 = scmp.ge.s32.totalorder %s22_s17, 4   ;;  %s1154_s14 = sld [smem:[#allocation18_spill]] }
  0xe4   : > { %s1155_s15 = sld [smem:[#allocation14_spill]]  ;;  %s1157_s12 = smov %s899_s13 }
  0xe5   : > { %s1156_s16 = sld [smem:[#allocation16_spill]]  ;;  %21 = sbr.rel (!%p19_p2) target bundleno = 10 (0xa), region = 107 }
  0xe8   : > { %s1158_s13 = smov %s1153_s18 }
  0xea   :  { %509 = vsyncpa [#allocation3], 1 }
  0xeb   :  { %511 = vsyncpa [#allocation3 + $0x1], 1 }
  0xec   :  { %512 = vsyncpa [#allocation6], 1 }
  0xed   :  { %514 = vsyncpa [#allocation6 + $0x1], 1 }
  0xee   :  { %515 = vsyncpa [#allocation4], 1 }
  0xef   :  { %517 = vsyncpa [#allocation4 + $0x1], 1 }

</bundles_post_ra>
